<compile_context>
chip_gen: v7x
topology: tpu7x:2x2x1
jax: 0.10.0
libtpu: 0.0.40
codegen_flags: <defaults>
</compile_context>

<pallas_src>
import functools

import jax
import jax.numpy as jnp
from jax.experimental import pallas as pl
from jax.experimental.pallas import tpu as pltpu

IN_F = 784      # input features
HID = 196       # hidden features (logical)
HID_P = 256     # hidden features padded to 2x128 lanes
OUT = 10        # output features (logical)
OUT_P = 128     # output features padded to 1x128 lanes (lane-dense store)


def _round_up(n, m):
    return (n + m - 1) // m * m


def _fc_kernel(x_ref, w1_ref, b1_ref, w2_ref, b2_ref, o_ref):
    # hidden = relu(x @ W1 + b1)  -- bf16 MXU inputs, f32 accumulation.
    h = jnp.dot(x_ref[...], w1_ref[...], preferred_element_type=jnp.float32)
    h = jnp.maximum(h + b1_ref[...], 0.0)          # (TB, 256) + (1, 256)
    # out = hidden @ W2 + b2 -- hidden stays in vregs/VMEM, never hits HBM.
    o = jnp.dot(h.astype(jnp.bfloat16), w2_ref[...],
                preferred_element_type=jnp.float32)
    o_ref[...] = (o + b2_ref[...]).astype(o_ref.dtype)


@functools.partial(jax.jit, static_argnames=("tb",))
def fc_forward(x, w1, b1, w2, b2, *, tb=512):
    """x: any shape flattening to (-1, 784). Returns (B, 10) float32."""
    x2d = x.reshape(-1, IN_F)
    B = x2d.shape[0]

    # Batch tile: multiple of 16 (bf16 sublane packing), big enough to
    # amortize the ~0.35us per-grid-step overhead, small enough to stay far
    # below the 16/32 MiB scoped-VMEM defaults on v5e/v6e/v7x
    # (TB=512: ~1.6 MB double-buffered x + ~0.5 MB weights + ~0.5 MB out).
    TB = min(tb, _round_up(B, 16))
    Bp = _round_up(B, TB)

    # bf16 activations halve HBM read bytes; pad batch to a whole tile.
    x_bf = x2d.astype(jnp.bfloat16)
    if Bp != B:
        x_bf = jnp.pad(x_bf, ((0, Bp - B), (0, 0)))

    # Zero-pad weights/biases: hidden 196->256, output 10->128.
    w1p = jnp.zeros((IN_F, HID_P), jnp.bfloat16).at[:, :HID].set(
        w1.astype(jnp.bfloat16))
    b1p = jnp.zeros((1, HID_P), jnp.float32).at[:, :HID].set(
        b1.reshape(1, HID).astype(jnp.float32))
    w2p = jnp.zeros((HID_P, OUT_P), jnp.bfloat16).at[:HID, :OUT].set(
        w2.astype(jnp.bfloat16))
    b2p = jnp.zeros((1, OUT_P), jnp.float32).at[:, :OUT].set(
        b2.reshape(1, OUT).astype(jnp.float32))

    grid = (Bp // TB,)

    cost = pl.CostEstimate(
        flops=2 * Bp * IN_F * HID_P + 2 * Bp * HID_P * OUT_P,
        transcendentals=0,
        bytes_accessed=(Bp * IN_F * 2            # x (bf16)
                        + IN_F * HID_P * 2       # W1 (bf16)
                        + HID_P * OUT_P * 2      # W2 (bf16)
                        + (HID_P + OUT_P) * 4    # biases (f32)
                        + Bp * OUT_P * 4),       # output (f32)
    )

    out = pl.pallas_call(
        _fc_kernel,
        out_shape=jax.ShapeDtypeStruct((Bp, OUT_P), jnp.float32),
        grid_spec=pltpu.PrefetchScalarGridSpec(
            num_scalar_prefetch=0,
            grid=grid,
            in_specs=[
                # x streams one batch tile per grid step.
                pl.BlockSpec((TB, IN_F), lambda i: (i, 0)),
                # Weights / biases: constant index_map -> DMA'd once,
                # VMEM-resident across all batch tiles.
                pl.BlockSpec((IN_F, HID_P), lambda i: (0, 0)),
                pl.BlockSpec((1, HID_P), lambda i: (0, 0)),
                pl.BlockSpec((HID_P, OUT_P), lambda i: (0, 0)),
                pl.BlockSpec((1, OUT_P), lambda i: (0, 0)),
            ],
            out_specs=pl.BlockSpec((TB, OUT_P), lambda i: (i, 0)),
        ),
        compiler_params=pltpu.CompilerParams(
            dimension_semantics=("parallel",)),
        cost_estimate=cost,
    )(x_bf, w1p, b1p, w2p, b2p)

    return out[:B, :OUT]


def init_params(key):
    """Deterministic init matching nn.Linear shapes (weights stored (in, out))."""
    k1, k2, k3, k4 = jax.random.split(key, 4)
    lim1 = 1.0 / jnp.sqrt(784.0)
    lim2 = 1.0 / jnp.sqrt(196.0)
    w1 = jax.random.uniform(k1, (IN_F, HID), jnp.float32, -lim1, lim1)
    b1 = jax.random.uniform(k2, (HID,), jnp.float32, -lim1, lim1)
    w2 = jax.random.uniform(k3, (HID, OUT), jnp.float32, -lim2, lim2)
    b2 = jax.random.uniform(k4, (OUT,), jnp.float32, -lim2, lim2)
    return w1, b1, w2, b2


if __name__ == "__main__":
    key = jax.random.PRNGKey(0)
    kx, kp = jax.random.split(key)

    # Small MNIST-like batch: (B, 1, 28, 28) -> view(-1, 784)
    B = 8
    x = jax.random.normal(kx, (B, 1, 28, 28), jnp.float32)
    w1, b1, w2, b2 = init_params(kp)

    out = fc_forward(x, w1, b1, w2, b2)
    out = jax.block_until_ready(out)
    assert out.shape == (B, OUT)

    x2d = x.reshape(-1, IN_F)

    # Tight check vs a reference using the same bf16 inputs / f32 accumulation.
    h_ref = jnp.maximum(
        jnp.dot(x2d.astype(jnp.bfloat16), w1.astype(jnp.bfloat16),
                preferred_element_type=jnp.float32) + b1[None, :], 0.0)
    ref_bf16 = jnp.dot(h_ref.astype(jnp.bfloat16), w2.astype(jnp.bfloat16),
                       preferred_element_type=jnp.float32) + b2[None, :]
    assert jnp.allclose(out, ref_bf16, atol=2e-3, rtol=2e-3)

    # Loose check vs the full-f32 PyTorch-equivalent forward (bf16 rounding).
    ref_f32 = jnp.maximum(x2d @ w1 + b1[None, :], 0.0) @ w2 + b2[None, :]
    assert jnp.allclose(out, ref_f32, atol=5e-2, rtol=5e-2)

    print("KERNEL_OK")
</pallas_src>

<mosaic_0001>
module attributes {stable_mosaic.version = 11 : i64} {
  func.func @_fc_kernel(%arg0: i32, %arg1: memref<16x784xbf16, #tpu.memory_space<vmem>>, %arg2: memref<784x256xbf16, #tpu.memory_space<vmem>>, %arg3: memref<1x256xf32, #tpu.memory_space<vmem>>, %arg4: memref<256x128xbf16, #tpu.memory_space<vmem>>, %arg5: memref<1x128xf32, #tpu.memory_space<vmem>>, %arg6: memref<16x128xf32, #tpu.memory_space<vmem>>) attributes {dimension_semantics = [#tpu.dimension_semantics<parallel>], iteration_bounds = array<i64: 1>, scalar_prefetch = 0 : i64, scratch_operands = 0 : i64, tpu.core_type = #tpu.core_type<tc>, window_params = [{transform_indices = @transform_0, window_bounds = array<i64: 16, 784>}, {pipeline_mode = #tpu.pipeline_mode<synchronous>, transform_indices = @transform_1, window_bounds = array<i64: 784, 256>}, {pipeline_mode = #tpu.pipeline_mode<synchronous>, transform_indices = @transform_2, window_bounds = array<i64: 1, 256>}, {pipeline_mode = #tpu.pipeline_mode<synchronous>, transform_indices = @transform_3, window_bounds = array<i64: 256, 128>}, {pipeline_mode = #tpu.pipeline_mode<synchronous>, transform_indices = @transform_4, window_bounds = array<i64: 1, 128>}, {transform_indices = @transform_5, window_bounds = array<i64: 16, 128>}]} {
    %c0 = arith.constant 0 : index
    %c0_0 = arith.constant 0 : index
    %0 = vector.load %arg1[%c0, %c0_0] : memref<16x784xbf16, #tpu.memory_space<vmem>>, vector<16x784xbf16>
    %c0_1 = arith.constant 0 : index
    %c0_2 = arith.constant 0 : index
    %1 = vector.load %arg2[%c0_1, %c0_2] : memref<784x256xbf16, #tpu.memory_space<vmem>>, vector<784x256xbf16>
    %cst = arith.constant dense<0.000000e+00> : vector<16x256xf32>
    %2 = tpu.matmul %0, %1, %cst {dimension_numbers = #tpu.dot_dimension_numbers<[1], [0], [0], [1], [0, 0, 1, 1], [], []>} : vector<16x784xbf16>, vector<784x256xbf16>, vector<16x256xf32> -> vector<16x256xf32>
    %c0_3 = arith.constant 0 : index
    %c0_4 = arith.constant 0 : index
    %3 = vector.load %arg3[%c0_3, %c0_4] : memref<1x256xf32, #tpu.memory_space<vmem>>, vector<1x256xf32>
    %4 = vector.broadcast %3 : vector<1x256xf32> to vector<16x256xf32>
    %5 = arith.addf %2, %4 : vector<16x256xf32>
    %cst_5 = arith.constant 0.000000e+00 : f32
    %6 = vector.broadcast %cst_5 : f32 to vector<16x256xf32>
    %7 = arith.maximumf %5, %6 : vector<16x256xf32>
    %8 = arith.truncf %7 : vector<16x256xf32> to vector<16x256xbf16>
    %c0_6 = arith.constant 0 : index
    %c0_7 = arith.constant 0 : index
    %9 = vector.load %arg4[%c0_6, %c0_7] : memref<256x128xbf16, #tpu.memory_space<vmem>>, vector<256x128xbf16>
    %cst_8 = arith.constant dense<0.000000e+00> : vector<16x128xf32>
    %10 = tpu.matmul %8, %9, %cst_8 {dimension_numbers = #tpu.dot_dimension_numbers<[1], [0], [0], [1], [0, 0, 1, 1], [], []>} : vector<16x256xbf16>, vector<256x128xbf16>, vector<16x128xf32> -> vector<16x128xf32>
    %c0_9 = arith.constant 0 : index
    %c0_10 = arith.constant 0 : index
    %11 = vector.load %arg5[%c0_9, %c0_10] : memref<1x128xf32, #tpu.memory_space<vmem>>, vector<1x128xf32>
    %12 = vector.broadcast %11 : vector<1x128xf32> to vector<16x128xf32>
    %13 = arith.addf %10, %12 : vector<16x128xf32>
    %c0_11 = arith.constant 0 : index
    %c0_12 = arith.constant 0 : index
    %14 = vector.load %arg6[%c0_11, %c0_12] : memref<16x128xf32, #tpu.memory_space<vmem>>, vector<16x128xf32>
    tpu.vector_store %arg6[%c0_11, %c0_12], %13 {strides = array<i32>} : memref<16x128xf32, #tpu.memory_space<vmem>>, vector<16x128xf32>,
    return
  }
  func.func @transform_0(%arg0: i32) -> (i32, i32) {
    %c0_i32 = arith.constant 0 : i32
    %c0_i32_0 = arith.constant 0 : i32
    return %arg0, %c0_i32 : i32, i32
  }
  func.func @transform_1(%arg0: i32) -> (i32, i32) {
    %c0_i32 = arith.constant 0 : i32
    %c0_i32_0 = arith.constant 0 : i32
    %c0_i32_1 = arith.constant 0 : i32
    return %c0_i32, %c0_i32_0 : i32, i32
  }
  func.func @transform_2(%arg0: i32) -> (i32, i32) {
    %c0_i32 = arith.constant 0 : i32
    %c0_i32_0 = arith.constant 0 : i32
    %c0_i32_1 = arith.constant 0 : i32
    return %c0_i32, %c0_i32_0 : i32, i32
  }
  func.func @transform_3(%arg0: i32) -> (i32, i32) {
    %c0_i32 = arith.constant 0 : i32
    %c0_i32_0 = arith.constant 0 : i32
    %c0_i32_1 = arith.constant 0 : i32
    return %c0_i32, %c0_i32_0 : i32, i32
  }
  func.func @transform_4(%arg0: i32) -> (i32, i32) {
    %c0_i32 = arith.constant 0 : i32
    %c0_i32_0 = arith.constant 0 : i32
    %c0_i32_1 = arith.constant 0 : i32
    return %c0_i32, %c0_i32_0 : i32, i32
  }
  func.func @transform_5(%arg0: i32) -> (i32, i32) {
    %c0_i32 = arith.constant 0 : i32
    %c0_i32_0 = arith.constant 0 : i32
    return %arg0, %c0_i32 : i32, i32
  }
}

</mosaic_0001>

<bundles_post_ra>
// kernel: fc_forward.1
= control target key start
LH: loop header
LB: loop body
LE: loop exit
PB: predicated region body
PF: predicated region fallthrough
CT: control target
= control target key end

     0   :  { %vm664_vm0 = vcmask 130048   ;;  %s1769_s1 = inlined_call_operand.vmem [shape: bf16[784,256], index: 1, kind: input, shape index: {}]   ;;  %s1770_s0 = inlined_call_operand.vmem [shape: bf16[16,784], index: 0, kind: input, shape index: {}]   ;;  %s1771_s3 = inlined_call_operand.vmem [shape: bf16[256,128], index: 3, kind: input, shape index: {}]   ;;  %s1772_s2 = inlined_call_operand.vmem [shape: f32[1,256], index: 2, kind: input, shape index: {}]   ;;  %s1773_s4 = inlined_call_operand.vmem [shape: f32[1,128], index: 4, kind: input, shape index: {}]   ;;  %s1774_s5 = inlined_call_operand.vmem [shape: f32[16,128], index: 5, kind: output, shape index: {}]  }
   0x1   :  { %v1190_v0 = vld [vmem:[%s1769_s1 + $0x104] ss:$8 sps:$4 sm:$0xff]   ;;  %v1192_v1 = vld [vmem:[%s1769_s1 + $0x100] ss:$8 sps:$4 sm:$0xff]   ;;  %v1193_v2 = vld [vmem:[%s1769_s1 + $0x114] ss:$8 sps:$4 sm:$0xff]  }
   0x2   :  { %711 = vmatprep.subr.bf16.mxu0 %v1190_v0  ;;  %v1195_v3 = vld [vmem:[%s1769_s1 + $0x110] ss:$8 sps:$4 sm:$0xff]   ;;  %v1196_v4 = vld [vmem:[%s1769_s1 + $0x124] ss:$8 sps:$4 sm:$0xff]   ;;  %v1198_v5 = vld [vmem:[%s1769_s1 + $0x120] ss:$8 sps:$4 sm:$0xff]  }
   0x3   :  { %712 = vmatpush1.bf16.msra.mxu0 %v1192_v1  ;;  %v1199_v6 = vld [vmem:[%s1769_s1 + $0x134] ss:$8 sps:$4 sm:$0xff]   ;;  %v1201_v7 = vld [vmem:[%s1769_s1 + $0x130] ss:$8 sps:$4 sm:$0xff]   ;;  %v1202_v8 = vld [vmem:[%s1769_s1 + $0x144] ss:$8 sps:$4 sm:$0xff]  }
   0x4   :  { %713 = vmatprep.subr.bf16.mxu0 %v1193_v2  ;;  %v1204_v9 = vld [vmem:[%s1769_s1 + $0x140] ss:$8 sps:$4 sm:$0xff]   ;;  %v1205_v10 = vld [vmem:[%s1769_s1 + $0x154] ss:$8 sps:$4 sm:$0xff]   ;;  %v1207_v11 = vld [vmem:[%s1769_s1 + $0x150] ss:$8 sps:$4 sm:$0xff]  }
   0x5   :  { %v1232_v12 = vld [vmem:[%s1769_s1 + $0x4] ss:$8 sps:$4 sm:$0xff]   ;;  %v1234_v13 = vld [vmem:[%s1769_s1] ss:$8 sps:$4 sm:$0xff]   ;;  %v1238_v15 = vld [vmem:[%s1769_s1 + $0x14] ss:$8 sps:$4 sm:$0xff]  }
   0x6   :  { %v1208_v14 = vld [vmem:[%s1769_s1 + $0x164] ss:$8 sps:$4 sm:$0xff]   ;;  %668 = vmatprep.subr.bf16.mxu1 %v1232_v12  ;;  %v1240_v16 = vld [vmem:[%s1769_s1 + $0x10] ss:$8 sps:$4 sm:$0xff]   ;;  %v1210_v17 = vld [vmem:[%s1769_s1 + $0x160] ss:$8 sps:$4 sm:$0xff]  }
   0x7   :  { %714 = vmatpush1.bf16.msra.mxu0 %v1195_v3  ;;  %669 = vmatpush1.bf16.msra.mxu1 %v1234_v13  ;;  %v1211_v18 = vld [vmem:[%s1769_s1 + $0x174] ss:$8 sps:$4 sm:$0xff]   ;;  %v1244_v19 = vld [vmem:[%s1769_s1 + $0x24] ss:$8 sps:$4 sm:$0xff]   ;;  %v1246_v20 = vld [vmem:[%s1769_s1 + $0x20] ss:$8 sps:$4 sm:$0xff]  }
   0x8   :  { %715 = vmatprep.subr.bf16.mxu0 %v1196_v4  ;;  %670 = vmatprep.subr.bf16.mxu1 %v1238_v15  ;;  %v1249_v21 = vld [vmem:[%s1770_s0 + $0xc] ss:$28 sps:$4 sm:$0xff]   ;;  %v1213_v22 = vld [vmem:[%s1769_s1 + $0x170] ss:$8 sps:$4 sm:$0xff]   ;;  %v1253_v24 = vld [vmem:[%s1769_s1 + $0x34] ss:$8 sps:$4 sm:$0xff]  }
   0x9   :  { %v1214_v23 = vld [vmem:[%s1769_s1 + $0x184] ss:$8 sps:$4 sm:$0xff]   ;;  %743 = vmatprep.mubr.bf16.mxu0 %v1249_v21  ;;  %v1255_v25 = vld [vmem:[%s1769_s1 + $0x30] ss:$8 sps:$4 sm:$0xff]   ;;  %v1216_v26 = vld [vmem:[%s1769_s1 + $0x180] ss:$8 sps:$4 sm:$0xff]  }
   0xa   :  { %v1259_v27 = vld [vmem:[%s1769_s1 + $0x44] ss:$8 sps:$4 sm:$0xff]   ;;  %v1217_v28 = vld [vmem:[%s1769_s1 + $0x194] ss:$8 sps:$4 sm:$0xff]   ;;  %v1261_v29 = vld [vmem:[%s1769_s1 + $0x40] ss:$8 sps:$4 sm:$0xff]  }
   0xb   :  { %716 = vmatpush1.bf16.msra.mxu0 %v1198_v5  ;;  %671 = vmatpush1.bf16.msra.mxu1 %v1240_v16  ;;  %v1219_v30 = vld [vmem:[%s1769_s1 + $0x190] ss:$8 sps:$4 sm:$0xff]   ;;  %v1265_v31 = vld [vmem:[%s1769_s1 + $0x54] ss:$8 sps:$4 sm:$0xff]   ;;  %v1220_v32 = vld [vmem:[%s1769_s1 + $0x1a4] ss:$8 sps:$4 sm:$0xff]  }
   0xc   :  { %717 = vmatprep.subr.bf16.mxu0 %v1199_v6  ;;  %672 = vmatprep.subr.bf16.mxu1 %v1244_v19  ;;  %v1267_v33 = vld [vmem:[%s1769_s1 + $0x50] ss:$8 sps:$4 sm:$0xff]   ;;  %v1222_v34 = vld [vmem:[%s1769_s1 + $0x1a0] ss:$8 sps:$4 sm:$0xff]   ;;  %v1271_v35 = vld [vmem:[%s1769_s1 + $0x64] ss:$8 sps:$4 sm:$0xff]  }
   0xd   :  { %v1223_v36 = vld [vmem:[%s1769_s1 + $0x1b4] ss:$8 sps:$4 sm:$0xff]   ;;  %v1273_v37 = vld [vmem:[%s1769_s1 + $0x60] ss:$8 sps:$4 sm:$0xff]   ;;  %v1225_v38 = vld [vmem:[%s1769_s1 + $0x1b0] ss:$8 sps:$4 sm:$0xff]  }
   0xe   :  { %v1277_v39 = vld [vmem:[%s1769_s1 + $0x74] ss:$8 sps:$4 sm:$0xff]   ;;  %v1226_v40 = vld [vmem:[%s1769_s1 + $0x1c4] ss:$8 sps:$4 sm:$0xff]   ;;  %v1279_v41 = vld [vmem:[%s1769_s1 + $0x70] ss:$8 sps:$4 sm:$0xff]  }
   0xf   :  { %718 = vmatpush1.bf16.msra.mxu0 %v1201_v7  ;;  %673 = vmatpush1.bf16.msra.mxu1 %v1246_v20  ;;  %v1228_v42 = vld [vmem:[%s1769_s1 + $0x1c0] ss:$8 sps:$4 sm:$0xff]   ;;  %v1283_v43 = vld [vmem:[%s1769_s1 + $0x84] ss:$8 sps:$4 sm:$0xff]   ;;  %v1229_v44 = vld [vmem:[%s1769_s1 + $0x1d4] ss:$8 sps:$4 sm:$0xff]  }
  0x10   :  { %719 = vmatprep.subr.bf16.mxu0 %v1202_v8  ;;  %674 = vmatprep.subr.bf16.mxu1 %v1253_v24  ;;  %v1285_v45 = vld [vmem:[%s1769_s1 + $0x80] ss:$8 sps:$4 sm:$0xff]   ;;  %v1231_v46 = vld [vmem:[%s1769_s1 + $0x1d0] ss:$8 sps:$4 sm:$0xff]   ;;  %v1289_v47 = vld [vmem:[%s1769_s1 + $0x94] ss:$8 sps:$4 sm:$0xff]  }
  0x11   :  { %v1235_v48 = vld [vmem:[%s1769_s1 + $0x1e4] ss:$8 sps:$4 sm:$0xff]   ;;  %v1291_v49 = vld [vmem:[%s1769_s1 + $0x90] ss:$8 sps:$4 sm:$0xff]   ;;  %v1237_v50 = vld [vmem:[%s1769_s1 + $0x1e0] ss:$8 sps:$4 sm:$0xff]  }
  0x12   :  { %v1295_v51 = vld [vmem:[%s1769_s1 + $0xa4] ss:$8 sps:$4 sm:$0xff]   ;;  %v1241_v52 = vld [vmem:[%s1769_s1 + $0x1f4] ss:$8 sps:$4 sm:$0xff]   ;;  %v1297_v53 = vld [vmem:[%s1769_s1 + $0xa0] ss:$8 sps:$4 sm:$0xff]  }
  0x13   :  { %720 = vmatpush1.bf16.msra.mxu0 %v1204_v9  ;;  %675 = vmatpush1.bf16.msra.mxu1 %v1255_v25  ;;  %v1243_v54 = vld [vmem:[%s1769_s1 + $0x1f0] ss:$8 sps:$4 sm:$0xff]   ;;  %v1301_v55 = vld [vmem:[%s1769_s1 + $0xb4] ss:$8 sps:$4 sm:$0xff]   ;;  %v1252_v56 = vld [vmem:[%s1769_s1 + $0x204] ss:$8 sps:$4 sm:$0xff]  }
  0x14   :  { %721 = vmatprep.subr.bf16.mxu0 %v1205_v10  ;;  %676 = vmatprep.subr.bf16.mxu1 %v1259_v27  ;;  %v1247_v57 = vld [vmem:[%s1770_s0 + $0x8] ss:$28 sps:$4 sm:$0xff]   ;;  %v1303_v59 = vld [vmem:[%s1769_s1 + $0xb0] ss:$8 sps:$4 sm:$0xff]   ;;  %v1258_v62 = vld [vmem:[%s1769_s1 + $0x214] ss:$8 sps:$4 sm:$0xff]  }
  0x15   :  { %v1250_v58 = vld [vmem:[%s1769_s1 + $0x200] ss:$8 sps:$4 sm:$0xff]   ;;  %v1307_v60 = vld [vmem:[%s1769_s1 + $0xc4] ss:$8 sps:$4 sm:$0xff]   ;;  %v1256_v0 = vld [vmem:[%s1769_s1 + $0x210] ss:$8 sps:$4 sm:$0xff]  }
  0x16   :  { %v1333_v61 = vld [vmem:[%s1770_s0 + $0x4] ss:$28 sps:$4 sm:$0xff]   ;;  %v1313_v1 = vld [vmem:[%s1769_s1 + $0xd4] ss:$8 sps:$4 sm:$0xff]   ;;  %v1315_v5 = vld [vmem:[%s1769_s1 + $0xd0] ss:$8 sps:$4 sm:$0xff]  }
  0x17   :  { %722 = vmatpush1.bf16.msra.mxu0 %v1207_v11  ;;  %677 = vmatpush1.bf16.msra.mxu1 %v1261_v29  ;;  %v1309_v63 = vld [vmem:[%s1769_s1 + $0xc0] ss:$8 sps:$4 sm:$0xff]   ;;  %v1264_v2 = vld [vmem:[%s1769_s1 + $0x224] ss:$8 sps:$4 sm:$0xff]   ;;  %v1345_v4 = vld [vmem:[%s1770_s0 + $0x14] ss:$28 sps:$4 sm:$0xff]  }
  0x18   :  { %723 = vmatprep.subr.bf16.mxu0 %v1208_v14  ;;  %678 = vmatprep.subr.bf16.mxu1 %v1265_v31  ;;  %v1262_v3 = vld [vmem:[%s1769_s1 + $0x220] ss:$8 sps:$4 sm:$0xff]   ;;  %v1319_v6 = vld [vmem:[%s1769_s1 + $0xe4] ss:$8 sps:$4 sm:$0xff]   ;;  %v1270_v7 = vld [vmem:[%s1769_s1 + $0x234] ss:$8 sps:$4 sm:$0xff]  }
  0x19   :  { %700 = vmatprep.mubr.bf16.mxu1 %v1333_v61  ;;  %v1268_v8 = vld [vmem:[%s1769_s1 + $0x230] ss:$8 sps:$4 sm:$0xff]   ;;  %v1321_v9 = vld [vmem:[%s1769_s1 + $0xe0] ss:$8 sps:$4 sm:$0xff]   ;;  %v1325_v10 = vld [vmem:[%s1769_s1 + $0xf4] ss:$8 sps:$4 sm:$0xff]  }
  0x1a   :  { %v1276_v11 = vld [vmem:[%s1769_s1 + $0x244] ss:$8 sps:$4 sm:$0xff]   ;;  %v1327_v12 = vld [vmem:[%s1769_s1 + $0xf0] ss:$8 sps:$4 sm:$0xff]   ;;  %v1274_v13 = vld [vmem:[%s1769_s1 + $0x240] ss:$8 sps:$4 sm:$0xff]  }
  0x1b   :  { %724 = vmatpush1.bf16.msra.mxu0 %v1210_v17  ;;  %679 = vmatpush1.bf16.msra.mxu1 %v1267_v33  ;;  %v1339_v14 = vld [vmem:[%s1769_s1 + $0x304] ss:$8 sps:$4 sm:$0xff]   ;;  %v1282_v15 = vld [vmem:[%s1769_s1 + $0x254] ss:$8 sps:$4 sm:$0xff]   ;;  %v1337_v17 = vld [vmem:[%s1769_s1 + $0x300] ss:$8 sps:$4 sm:$0xff]  }
  0x1c   :  { %725 = vmatprep.subr.bf16.mxu0 %v1211_v18  ;;  %680 = vmatprep.subr.bf16.mxu1 %v1271_v35  ;;  %v1331_v16 = vld [vmem:[%s1770_s0] ss:$28 sps:$4 sm:$0xff]   ;;  %v1280_v18 = vld [vmem:[%s1769_s1 + $0x250] ss:$8 sps:$4 sm:$0xff]   ;;  %v1288_v20 = vld [vmem:[%s1769_s1 + $0x264] ss:$8 sps:$4 sm:$0xff]  }
  0x1d   :  { %v1347_v19 = vld [vmem:[%s1771_s3 + $0x40] sm:$0xff]   ;;  %v1363_v21 = vmov 0   ;;  %v1346_v24 = vld [vmem:[%s1770_s0 + $0x18] ss:$28 sps:$4 sm:$0xff]   ;;  %v1349_v27 = vld [vmem:[%s1771_s3 + $0x48] sm:$0xff]  }
  0x1e   :  { %v1348_v25 = vld [vmem:[%s1771_s3] sm:$0xff]   ;;  %v1350_v29 = vld [vmem:[%s1771_s3 + $0x8] sm:$0xff]   ;;  %v1351_v31 = vld [vmem:[%s1771_s3 + $0x50] sm:$0xff]  }
  0x1f   :  { %726 = vmatpush1.bf16.msra.mxu0 %v1213_v22  ;;  %681 = vmatpush1.bf16.msra.mxu1 %v1273_v37  ;;  %v1286_v22 = vld [vmem:[%s1769_s1 + $0x260] ss:$8 sps:$4 sm:$0xff]   ;;  %v1352_v33 = vld [vmem:[%s1771_s3 + $0x10] sm:$0xff]   ;;  %v1312_v35 = vld [vmem:[%s1769_s1 + $0x2a4] ss:$8 sps:$4 sm:$0xff]  }
  0x20   :  { %727 = vmatprep.subr.bf16.mxu0 %v1214_v23  ;;  %682 = vmatprep.subr.bf16.mxu1 %v1277_v39  ;;  %v1294_v23 = vld [vmem:[%s1769_s1 + $0x274] ss:$8 sps:$4 sm:$0xff]   ;;  %v1324_v39 = vld [vmem:[%s1769_s1 + $0x2c4] ss:$8 sps:$4 sm:$0xff]  }
  0x21   :  { %v1318_v37 = vld [vmem:[%s1769_s1 + $0x2b4] ss:$8 sps:$4 sm:$0xff]  }
  0x23   :  { %728 = vmatpush1.bf16.msra.mxu0 %v1216_v26  ;;  %683 = vmatpush1.bf16.msra.mxu1 %v1279_v41  ;;  %v1292_v26 = vld [vmem:[%s1769_s1 + $0x270] ss:$8 sps:$4 sm:$0xff]   ;;  %v1330_v41 = vld [vmem:[%s1769_s1 + $0x2d4] ss:$8 sps:$4 sm:$0xff]  }
  0x24   :  { %729 = vmatprep.subr.bf16.mxu0 %v1217_v28  ;;  %684 = vmatprep.subr.bf16.mxu1 %v1283_v43  ;;  %v1300_v28 = vld [vmem:[%s1769_s1 + $0x284] ss:$8 sps:$4 sm:$0xff]  }
  0x25   :  { %v1336_v43 = vld [vmem:[%s1769_s1 + $0x2e4] ss:$8 sps:$4 sm:$0xff]  }
  0x27   :  { %730 = vmatpush1.bf16.msra.mxu0 %v1219_v30  ;;  %685 = vmatpush1.bf16.msra.mxu1 %v1285_v45  ;;  %v1298_v30 = vld [vmem:[%s1769_s1 + $0x280] ss:$8 sps:$4 sm:$0xff]   ;;  %v1342_v45 = vld [vmem:[%s1769_s1 + $0x2f4] ss:$8 sps:$4 sm:$0xff]  }
  0x28   :  { %731 = vmatprep.subr.bf16.mxu0 %v1220_v32  ;;  %686 = vmatprep.subr.bf16.mxu1 %v1289_v47  ;;  %v1306_v32 = vld [vmem:[%s1769_s1 + $0x294] ss:$8 sps:$4 sm:$0xff]   ;;  %v1343_v47 = vld [vmem:[%s1770_s0 + $0x10] ss:$28 sps:$4 sm:$0xff]  }
  0x2b   :  { %732 = vmatpush1.bf16.msra.mxu0 %v1222_v34  ;;  %687 = vmatpush1.bf16.msra.mxu1 %v1291_v49  ;;  %v1304_v34 = vld [vmem:[%s1769_s1 + $0x290] ss:$8 sps:$4 sm:$0xff]  }
  0x2c   :  { %733 = vmatprep.subr.bf16.mxu0 %v1223_v36  ;;  %688 = vmatprep.subr.bf16.mxu1 %v1295_v51  ;;  %v1310_v36 = vld [vmem:[%s1769_s1 + $0x2a0] ss:$8 sps:$4 sm:$0xff]   ;;  %v1354_v49 = vld [vmem:[%s1771_s3 + $0x18] sm:$0xff]  }
  0x2d   :  { %v1356_v51 = vld [vmem:[%s1771_s3 + $0x20] sm:$0xff]  }
  0x2f   :  { %734 = vmatpush1.bf16.msra.mxu0 %v1225_v38  ;;  %689 = vmatpush1.bf16.msra.mxu1 %v1297_v53  ;;  %v1316_v38 = vld [vmem:[%s1769_s1 + $0x2b0] ss:$8 sps:$4 sm:$0xff]   ;;  %v1358_v53 = vld [vmem:[%s1771_s3 + $0x28] sm:$0xff]  }
  0x30   :  { %735 = vmatprep.subr.bf16.mxu0 %v1226_v40  ;;  %690 = vmatprep.subr.bf16.mxu1 %v1301_v55  ;;  %v1322_v40 = vld [vmem:[%s1769_s1 + $0x2c0] ss:$8 sps:$4 sm:$0xff]   ;;  %v1360_v55 = vld [vmem:[%s1771_s3 + $0x30] sm:$0xff]  }
  0x33   :  { %736 = vmatpush1.bf16.msra.mxu0 %v1228_v42  ;;  %691 = vmatpush1.bf16.msra.mxu1 %v1303_v59  ;;  %v1328_v42 = vld [vmem:[%s1769_s1 + $0x2d0] ss:$8 sps:$4 sm:$0xff]  }
  0x34   :  { %737 = vmatprep.subr.bf16.mxu0 %v1229_v44  ;;  %692 = vmatprep.subr.bf16.mxu1 %v1307_v60  ;;  %v1334_v44 = vld [vmem:[%s1769_s1 + $0x2e0] ss:$8 sps:$4 sm:$0xff]  }
  0x37   :  { %738 = vmatpush1.bf16.msra.mxu0 %v1231_v46  ;;  %693 = vmatpush1.bf16.msra.mxu1 %v1309_v63  ;;  %v1340_v46 = vld [vmem:[%s1769_s1 + $0x2f0] ss:$8 sps:$4 sm:$0xff]  }
  0x38   :  { %739 = vmatprep.subr.bf16.mxu0 %v1235_v48  ;;  %694 = vmatprep.subr.bf16.mxu1 %v1313_v1  ;;  %v1353_v48 = vld [vmem:[%s1771_s3 + $0x58] sm:$0xff]  }
  0x3b   :  { %740 = vmatpush1.bf16.msra.mxu0 %v1237_v50  ;;  %695 = vmatpush1.bf16.msra.mxu1 %v1315_v5  ;;  %v1355_v50 = vld [vmem:[%s1771_s3 + $0x60] sm:$0xff]  }
  0x3c   :  { %741 = vmatprep.subr.bf16.mxu0 %v1241_v52  ;;  %696 = vmatprep.subr.bf16.mxu1 %v1319_v6  ;;  %v1357_v52 = vld [vmem:[%s1771_s3 + $0x68] sm:$0xff]   ;;  %v127_v5 = vld [vmem:[%s1772_s2] sm:$0x3] }
  0x3f   :  { %742 = vmatpush1.bf16.msra.mxu0 %v1243_v54  ;;  %697 = vmatpush1.bf16.msra.mxu1 %v1321_v9  ;;  %v1359_v54 = vld [vmem:[%s1771_s3 + $0x70] sm:$0xff]  }
  0x40   :  { %754 = vmatprep.subr.bf16.mxu0 %v1252_v56  ;;  %698 = vmatprep.subr.bf16.mxu1 %v1325_v10  ;;  %v1361_v56 = vld [vmem:[%s1771_s3 + $0x78] sm:$0xff]  }
  0x42   :  { %744 = vmatmul.mubr.bf16.vlgmr.msra.gmra.mrb[0].mxu0 %v1247_v57  ;;  %v1362_v57 = vld [vmem:[%s1771_s3 + $0x38] sm:$0xff]  }
  0x43   :  { %755 = vmatpush1.bf16.msra.mxu0 %v1250_v58  ;;  %786 = vmatprep.mubr.bf16.mxu0 %v1345_v4 }
  0x44   :  { %756 = vmatprep.subr.bf16.mxu0 %v1258_v62  ;;  %699 = vmatpush1.bf16.msra.mxu1 %v1327_v12 }
  0x45   :  { %797 = vmatprep.subr.bf16.mxu1 %v1339_v14 }
  0x47   :  { %757 = vmatpush1.bf16.msra.mxu0 %v1256_v0  ;;  %701 = vmatmul.mubr.bf16.vlgmr.msra.gmra.mrb[0].mxu1 %v1331_v16 }
  0x48   :  { %758 = vmatprep.subr.bf16.mxu0 %v1264_v2  ;;  %798 = vmatpush1.bf16.msra.mxu1 %v1337_v17  ;;  %v129_v2 = vlaneseq }
  0x49   :  { %829 = vmatprep.mubr.bf16.mxu1 %v1363_v21  ;;  %1151 = vmatprep.subr.bf16.mxu1 %v1347_v19 }
  0x4b   :  { %759 = vmatpush1.bf16.msra.mxu0 %v1262_v3  ;;  %v130_v3 = vshrl.u32 %v129_v2, 7 }
  0x4c   :  { %760 = vmatprep.subr.bf16.mxu0 %v1270_v7 }
  0x4d   :  { %v131_v4 = vsub.s32 0, %v130_v3  ;;  %v135_v6 = vsub.s32 1, %v130_v3 }
  0x4f   :  { %761 = vmatpush1.bf16.msra.mxu0 %v1268_v8  ;;  %1133 = vmatmul.mubr.msk.bf16.vlgmr.msra.gmra.mrb[4].mxu1 %vm664_vm0, %v1346_v24  ;;  %v132_v7 = vrot.slane %v127_v5, %v131_v4  ;;  %v136_v8 = vrot.slane %v127_v5, %v135_v6 }
  0x50   :  { %762 = vmatprep.subr.bf16.mxu0 %v1276_v11  ;;  %1152 = vmatpush3.bf16.msra.mxu1 %v1348_v25 }
  0x51   :  { %1153 = vmatprep.subr.bf16.mxu1 %v1349_v27 }
  0x53   :  { %763 = vmatpush1.bf16.msra.mxu0 %v1274_v13 }
  0x54   :  { %764 = vmatprep.subr.bf16.mxu0 %v1282_v15  ;;  %1154 = vmatpush3.bf16.msra.mxu1 %v1350_v29 }
  0x55   :  { %1155 = vmatprep.subr.bf16.mxu1 %v1351_v31 }
  0x57   :  { %765 = vmatpush1.bf16.msra.mxu0 %v1280_v18 }
  0x58   :  { %766 = vmatprep.subr.bf16.mxu0 %v1288_v20  ;;  %1156 = vmatpush3.bf16.msra.mxu1 %v1352_v33 }
  0x59   :  { %1157 = vmatprep.subr.bf16.mxu1 %v1353_v48 }
  0x5b   :  { %767 = vmatpush1.bf16.msra.mxu0 %v1286_v22 }
  0x5c   :  { %768 = vmatprep.subr.bf16.mxu0 %v1294_v23  ;;  %1158 = vmatpush3.bf16.msra.mxu1 %v1354_v49 }
  0x5d   :  { %1159 = vmatprep.subr.bf16.mxu1 %v1355_v50 }
  0x5f   :  { %769 = vmatpush1.bf16.msra.mxu0 %v1292_v26 }
  0x60   :  { %770 = vmatprep.subr.bf16.mxu0 %v1300_v28  ;;  %1160 = vmatpush3.bf16.msra.mxu1 %v1356_v51 }
  0x61   :  { %1161 = vmatprep.subr.bf16.mxu1 %v1357_v52 }
  0x63   :  { %771 = vmatpush1.bf16.msra.mxu0 %v1298_v30 }
  0x64   :  { %772 = vmatprep.subr.bf16.mxu0 %v1306_v32  ;;  %1162 = vmatpush3.bf16.msra.mxu1 %v1358_v53  ;;  %v1134_v32 = vld [vmem:[%s1773_s4] ss:$0 sm:$0xff] }
  0x65   :  { %1163 = vmatprep.subr.bf16.mxu1 %v1359_v54 }
  0x67   :  { %773 = vmatpush1.bf16.msra.mxu0 %v1304_v34 }
  0x68   :  { %774 = vmatprep.subr.bf16.mxu0 %v1312_v35  ;;  %1164 = vmatpush3.bf16.msra.mxu1 %v1360_v55 }
  0x69   :  { %1165 = vmatprep.subr.bf16.mxu1 %v1361_v56 }
  0x6b   :  { %775 = vmatpush1.bf16.msra.mxu0 %v1310_v36 }
  0x6c   :  { %776 = vmatprep.subr.bf16.mxu0 %v1318_v37  ;;  %1166 = vmatpush3.bf16.msra.mxu1 %v1362_v57 }
  0x6f   :  { %777 = vmatpush1.bf16.msra.mxu0 %v1316_v38 }
  0x70   :  { %778 = vmatprep.subr.bf16.mxu0 %v1324_v39 }
  0x73   :  { %779 = vmatpush1.bf16.msra.mxu0 %v1322_v40 }
  0x74   :  { %780 = vmatprep.subr.bf16.mxu0 %v1330_v41 }
  0x77   :  { %781 = vmatpush1.bf16.msra.mxu0 %v1328_v42 }
  0x78   :  { %782 = vmatprep.subr.bf16.mxu0 %v1336_v43 }
  0x7b   :  { %783 = vmatpush1.bf16.msra.mxu0 %v1334_v44 }
  0x7c   :  { %784 = vmatprep.subr.bf16.mxu0 %v1342_v45 }
  0x7f   :  { %785 = vmatpush1.bf16.msra.mxu0 %v1340_v46 }
  0x82   :  { %787 = vmatmul.mubr.bf16.vlgmr.msra.gmra.mrb[0].mxu0 %v1343_v47 }
 0x11a   :  { %v702_v58 = vpop.f32.mrb[0].mxu1 }
 0x11b   :  { %v704_v59 = vpop.f32.mrb[1].mxu1  ;;  %v703_v9 = vadd.f32 %v702_v58, %v132_v7 }
 0x11c   :  { %v706_v60 = vpop.f32.mrb[2].mxu1  ;;  %v705_v10 = vadd.f32 %v704_v59, %v136_v8 }
 0x11d   :  { %v708_v61 = vpop.f32.mrb[3].mxu1  ;;  %v707_v12 = vadd.f32 %v706_v60, %v132_v7 }
 0x11e   :  { %v709_v15 = vadd.f32 %v708_v61, %v136_v8 }
 0x122   :  { %v831_v62 = vpop.f32.mrb[4].mxu1 }
 0x123   :  { %v833_v63 = vpop.f32.mrb[5].mxu1 }
 0x124   :  { %v835_v0 = vpop.f32.mrb[6].mxu1 }
 0x125   :  { %v837_v1 = vpop.f32.mrb[7].mxu1 }
 0x155   :  { %v788_v11 = vpop.f32.mrb[0].mxu0 }
 0x156   :  { %v1174_v13 = vadd.f32 %v788_v11, %v703_v9  ;;  %v790_v14 = vpop.f32.mrb[1].mxu0 }
 0x157   :  { %v1177_v16 = vadd.f32 %v790_v14, %v705_v10  ;;  %v792_v17 = vpop.f32.mrb[2].mxu0 }
 0x158   :  { %v1175_v18 = vadd.f32 %v1174_v13, %v831_v62  ;;  %v1180_v19 = vadd.f32 %v792_v17, %v707_v12  ;;  %v794_v20 = vpop.f32.mrb[3].mxu0 }
 0x159   :  { %v1178_v21 = vadd.f32 %v1177_v16, %v833_v63  ;;  %v1183_v22 = vadd.f32 %v794_v20, %v709_v15 }
 0x15a   :  { %v1181_v23 = vadd.f32 %v1180_v19, %v835_v0  ;;  %v840_v25 = vmax.f32 %v1175_v18, 0.0 }
 0x15b   :  { %v1184_v24 = vadd.f32 %v1183_v22, %v837_v1  ;;  %v841_v27 = vmax.f32 %v1178_v21, 0.0 }
 0x15c   :  { %v842_v26 = vmax.f32 %v1181_v23, 0.0 }
 0x15d   :  { %v843_v28 = vmax.f32 %v1184_v24, 0.0 }
 0x15e   :  { %v844_v29 = vpack.c.bf16 %v842_v26, %v840_v25 }
 0x15f   :  { %v845_v30 = vpack.c.bf16 %v843_v28, %v841_v27 }
 0x161   :  { %1013 = vmatprep.mubr.bf16.mxu1 %v845_v30 }
 0x162   :  { %1014 = vmatmul.mubr.bf16.vlgmr.msra.gmra.mrb[8].mxu1 %v844_v29 }
 0x235   :  { %v1167_v31 = vpop.f32.mrb[8].mxu1 }
 0x236   :  { %v1168_v33 = vpop.f32.mrb[9].mxu1 }
 0x237   :  { %v1169_v34 = vadd.f32 %v1168_v33, %v1167_v31  ;;  %v1170_v35 = vpop.f32.mrb[10].mxu1 }
 0x238   :  { %v1171_v36 = vpop.f32.mrb[11].mxu1 }
 0x239   :  { %v1016_v37 = vadd.f32 %v1169_v34, %v1134_v32  ;;  %v1172_v38 = vadd.f32 %v1171_v36, %v1170_v35 }
 0x23b   :  { %1022 = vst [vmem:[%s1774_s5] sm:$0xff] %v1016_v37  ;;  %v1019_v39 = vadd.f32 %v1172_v38, %v1134_v32 }
 0x23d   :  { %1023 = vst [vmem:[%s1774_s5 + $0x8] sm:$0xff] %v1019_v39 }

</bundles_post_ra>
